<compile_context>
chip_gen: v5e
topology: v5e:2x2
jax: 0.10.0
libtpu: 0.0.40
codegen_flags: <defaults>
</compile_context>

<pallas_src>
import functools
import math

import jax
import jax.numpy as jnp
from jax import lax
from jax.experimental import pallas as pl
from jax.experimental.pallas import tpu as pltpu


# ---------------------------------------------------------------------------
# helpers
# ---------------------------------------------------------------------------

_NEG_INF = -1e30
_DEFAULT_SCOPED_VMEM = 32 * 1024 * 1024


def _pick_tile(dim: int, target: int) -> int:
    """Largest divisor of `dim` <= target, preferring multiples of 128 (MXU /
    lane), then 16 (bf16 sublane), then 8 (f32 sublane); else the full dim."""
    if dim <= target:
        return dim
    for quantum in (128, 16, 8):
        t = (target // quantum) * quantum
        while t >= quantum:
            if dim % t == 0:
                return t
            t -= quantum
    return dim


def _pick_lane_tile(dim: int, target: int) -> int:
    """Like _pick_tile but restricted to multiples of 128 so a partial block
    along the lane (last) dimension stays legal."""
    if dim <= target:
        return dim
    t = (target // 128) * 128
    while t >= 128:
        if dim % t == 0:
            return t
        t -= 128
    return dim


def _chip_vmem_bytes() -> int:
    try:
        return int(pltpu.get_tpu_info().vmem_capacity_bytes)
    except Exception:  # conservative fallback (v7x has 64 MiB per core)
        return 64 * 1024 * 1024


def _maybe_vmem_limit(est_bytes: int):
    """Raise the scoped-VMEM limit only when the block estimate needs it, and
    never above the physical VMEM of the chip (minus headroom)."""
    need = int(est_bytes * 1.25)
    if need <= _DEFAULT_SCOPED_VMEM:
        return None
    cap = max(_DEFAULT_SCOPED_VMEM, _chip_vmem_bytes() - 8 * 1024 * 1024)
    return min(cap, need)


# ---------------------------------------------------------------------------
# tiled linear:  y = x @ W + b   (PyTorch nn.Linear semantics, W is (in, out))
# ---------------------------------------------------------------------------

def _linear_kernel(x_ref, w_ref, b_ref, o_ref, *, mxu_dtype):
    x = x_ref[...].astype(mxu_dtype)          # MXU operands, f32 accumulation
    w = w_ref[...].astype(mxu_dtype)          # cast per block: no HBM weight copies
    acc = jnp.dot(x, w, preferred_element_type=jnp.float32)
    acc = acc + b_ref[...].astype(jnp.float32)
    o_ref[...] = acc.astype(o_ref.dtype)


def _linear(x2d, w, b, *, out_dtype, mxu_dtype, tm_target=512, tn_target=1024):
    """Row (tm) and output-column (tn) tiled matmul.

    The weight block is (K, tn) -- never the full (C, 3C) -- so the VMEM
    reservation stays small even on v7x.  Column tiles run on the outer grid
    axis so each weight tile is DMA'd once and reused across all row tiles.
    # TODO(synk): tile K as well for very large embedding dims (> 4k).
    """
    M, K = x2d.shape
    N = w.shape[1]
    tm = _pick_tile(M, tm_target)
    tn = _pick_lane_tile(N, tn_target)
    b2d = b.reshape(1, N)

    bpe_x = jnp.dtype(x2d.dtype).itemsize
    bpe_w = jnp.dtype(w.dtype).itemsize
    bpe_o = jnp.dtype(out_dtype).itemsize
    est = 2 * (tm * K * bpe_x + K * tn * bpe_w + tn * 4 + tm * tn * bpe_o)

    kernel = functools.partial(_linear_kernel, mxu_dtype=mxu_dtype)
    return pl.pallas_call(
        kernel,
        out_shape=jax.ShapeDtypeStruct((M, N), out_dtype),
        grid_spec=pltpu.PrefetchScalarGridSpec(
            num_scalar_prefetch=0,
            grid=(N // tn, M // tm),     # column tiles outer -> weights resident
            in_specs=[
                pl.BlockSpec((tm, K), lambda n, m: (m, 0)),
                pl.BlockSpec((K, tn), lambda n, m: (0, n)),
                pl.BlockSpec((1, tn), lambda n, m: (0, n)),
            ],
            out_specs=pl.BlockSpec((tm, tn), lambda n, m: (m, n)),
        ),
        compiler_params=pltpu.CompilerParams(
            dimension_semantics=("parallel", "parallel"),
            vmem_limit_bytes=_maybe_vmem_limit(est),
        ),
    )(x2d, w, b2d)


# ---------------------------------------------------------------------------
# causal flash attention over a (B, q_tile, H, kv_tile) grid
# ---------------------------------------------------------------------------

def _flash_kernel(q_ref, k_ref, v_ref, o_ref, m_sc, l_sc, acc_sc, *,
                  tq, tk, scale, mxu_dtype):
    qi = pl.program_id(1)
    h = pl.program_id(2)
    ki = pl.program_id(3)

    @pl.when(ki == 0)
    def _init():
        m_sc[...] = jnp.full_like(m_sc, _NEG_INF)
        l_sc[...] = jnp.zeros_like(l_sc)
        acc_sc[...] = jnp.zeros_like(acc_sc)

    first_q = qi * tq
    first_k = ki * tk
    visible = first_k <= first_q + (tq - 1)     # tile has >= 1 unmasked key
    on_diag = first_k + (tk - 1) > first_q      # tile intersects the diagonal

    def _step(masked):
        # 1/sqrt(D) applied to the q tile here ((tq, D) VPU mul, hidden under
        # the MXU) instead of rewriting the c_attn weights every forward.
        qh = (q_ref[0, 0] * scale).astype(mxu_dtype)        # (tq, D)
        kh = k_ref[0, 0].astype(mxu_dtype)                  # (tk, D)
        vh = v_ref[0, 0].astype(mxu_dtype)                  # (tk, D)

        # s = q @ k^T, contracting the last dims (no materialized k transpose).
        s = lax.dot_general(qh, kh, (((1,), (1,)), ((), ())),
                            preferred_element_type=jnp.float32)  # (tq, tk)
        if masked:   # only diagonal-straddling tiles pay for the mask
            row = first_q + lax.broadcasted_iota(jnp.int32, (tq, tk), 0)
            col = first_k + lax.broadcasted_iota(jnp.int32, (tq, tk), 1)
            s = jnp.where(row >= col, s, _NEG_INF)

        # Online softmax; statistics kept in f32 on every chip generation.
        # TODO(synk): on v6e/v7x a bf16 exp would ~double EUP throughput.
        m_prev = m_sc[...]
        m_new = jnp.maximum(m_prev, jnp.max(s, axis=-1, keepdims=True))
        alpha = jnp.exp(m_prev - m_new)
        p = jnp.exp(s - m_new)
        l_sc[...] = alpha * l_sc[...] + jnp.sum(p, axis=-1, keepdims=True)
        acc_sc[...] = alpha * acc_sc[...] + jnp.dot(
            p.astype(mxu_dtype), vh, preferred_element_type=jnp.float32)
        m_sc[...] = m_new

    @pl.when(jnp.logical_and(visible, jnp.logical_not(on_diag)))
    def _full_tile():
        _step(masked=False)

    @pl.when(jnp.logical_and(visible, on_diag))
    def _diag_tile():
        _step(masked=True)

    @pl.when(ki == pl.num_programs(3) - 1)
    def _finalize():
        # Normalize once on the (tq, D) output; approx reciprocal uses the
        # otherwise-idle EUP slot on the bf16 path.
        inv_l = pl.reciprocal(
            l_sc[...], approx=jnp.dtype(mxu_dtype) != jnp.dtype(jnp.float32))
        out = (acc_sc[...] * inv_l).astype(o_ref.dtype)      # (tq, D)
        # Write this head's slice straight into the (B, T, H, D) output slab.
        # The output block (1, tq, H, D) stays resident across the head axis,
        # so no XLA output transpose is needed and the HBM writeback is a
        # single contiguous (tq, C)-wide slab.
        o_ref[0, :, pl.ds(h, 1), :] = out[:, None, :]


def _flash_attention(q, k, v, *, scale, out_dtype, mxu_dtype,
                     tq_target=256, tk_target=512):
    """Causal flash attention.  Inputs are (B, H, T, D); output is (B, T, H, D)
    so the caller's reshape to (B*T, C) is a free contiguous view."""
    B, H, T, D = q.shape
    tq = _pick_tile(T, tq_target)
    tk = _pick_tile(T, tk_target)
    nq = T // tq
    nkv = T // tk

    def q_map(b, i, h, j):
        return (b, h, i, 0)

    def kv_map(b, i, h, j):
        # Clamp fully-masked kv tiles onto the last visible one: no new DMA is
        # issued for them and pl.when skips their compute.
        last_needed = (i * tq + (tq - 1)) // tk
        return (b, h, jnp.minimum(j, last_needed), 0)

    def o_map(b, i, h, j):
        return (b, i, 0, 0)

    bpe_in = jnp.dtype(q.dtype).itemsize
    bpe_out = jnp.dtype(out_dtype).itemsize
    dp = max(D, 128)
    hp = ((H + 7) // 8) * 8
    est = (2 * (tq + 2 * tk) * dp * bpe_in     # q, k, v (double-buffered)
           + 2 * tq * hp * dp * bpe_out        # (1, tq, H, D) output block
           + 4 * tq * (2 * 128 + dp))          # f32 m, l, acc scratch

    kernel = functools.partial(_flash_kernel, tq=tq, tk=tk, scale=scale,
                               mxu_dtype=mxu_dtype)
    # TODO(synk): for long T, fold the kv axis into the body with
    # pltpu.emit_pipeline over exactly last_needed+1 tiles so skipped causal
    # tiles stop costing ~600 cycles of grid-step overhead each.
    return pl.pallas_call(
        kernel,
        out_shape=jax.ShapeDtypeStruct((B, T, H, D), out_dtype),
        grid_spec=pltpu.PrefetchScalarGridSpec(
            num_scalar_prefetch=0,
            grid=(B, nq, H, nkv),
            in_specs=[
                pl.BlockSpec((1, 1, tq, D), q_map),
                pl.BlockSpec((1, 1, tk, D), kv_map),
                pl.BlockSpec((1, 1, tk, D), kv_map),
            ],
            out_specs=pl.BlockSpec((1, tq, H, D), o_map),
            scratch_shapes=[
                pltpu.VMEM((tq, 1), jnp.float32),   # running max  m
                pltpu.VMEM((tq, 1), jnp.float32),   # running sum  l
                pltpu.VMEM((tq, D), jnp.float32),   # unnormalized output acc
            ],
        ),
        compiler_params=pltpu.CompilerParams(
            # The head axis shares an output block -> must stay "arbitrary";
            # batch and q-tile axes give megacore its parallel work; kv is the
            # reduction axis and stays last.
            dimension_semantics=("parallel", "parallel", "arbitrary", "arbitrary"),
            vmem_limit_bytes=_maybe_vmem_limit(est),
        ),
    )(q, k, v)


# ---------------------------------------------------------------------------
# full module forward
# ---------------------------------------------------------------------------

def causal_self_attention(x, w_attn, b_attn, w_proj, b_proj, *, n_head,
                          mxu_dtype=jnp.bfloat16, tq=256, tk=512,
                          tm=512, tn=1024):
    """nanoGPT CausalSelfAttention forward.

    x: (B, T, C);  w_attn: (C, 3C), b_attn: (3C,);  w_proj: (C, C), b_proj: (C,)
    mxu_dtype : dtype fed to the MXU (bf16 recommended; accumulation and the
                softmax statistics are always f32).
    tq/tk/tm/tn : tile targets (tk >= tq amortizes the f32 acc rescale).
    """
    B, T, C = x.shape
    H = n_head
    assert C % H == 0
    D = C // H
    scale = 1.0 / math.sqrt(D)

    # --- c_attn: (B*T, C) @ (C, 3C) + b  (no per-call weight rewriting) ---
    qkv = _linear(x.reshape(B * T, C), w_attn, b_attn.reshape(-1),
                  out_dtype=mxu_dtype, mxu_dtype=mxu_dtype,
                  tm_target=tm, tn_target=tn)

    # Head split to (B, H, T, D).
    # TODO(synk): fold this transpose into the c_attn out_spec as well; per-head
    # column blocks need D >= 128 to be legal lane blocks, so at D=64 it would
    # require an in-kernel (tm, H, D) -> (H, tm, D) relayout.
    qkv = qkv.reshape(B, T, 3, H, D)
    q = qkv[:, :, 0].transpose(0, 2, 1, 3)
    k = qkv[:, :, 1].transpose(0, 2, 1, 3)
    v = qkv[:, :, 2].transpose(0, 2, 1, 3)

    # --- causal flash attention; output lands directly in (B, T, H, D) ---
    y = _flash_attention(q, k, v, scale=scale, out_dtype=mxu_dtype,
                         mxu_dtype=mxu_dtype, tq_target=tq, tk_target=tk)

    # --- c_proj: the reshape below is a free contiguous view ---
    out = _linear(y.reshape(B * T, C), w_proj, b_proj.reshape(-1),
                  out_dtype=x.dtype, mxu_dtype=mxu_dtype,
                  tm_target=tm, tn_target=tn)
    return out.reshape(B, T, C)


# ---------------------------------------------------------------------------
# pure-JAX reference mirroring the PyTorch forward
# ---------------------------------------------------------------------------

def reference(x, w_attn, b_attn, w_proj, b_proj, *, n_head):
    B, T, C = x.shape
    D = C // n_head
    qkv = x @ w_attn + b_attn.reshape(1, 1, -1)
    q, k, v = jnp.split(qkv, 3, axis=-1)

    def heads(t):
        return t.reshape(B, T, n_head, D).transpose(0, 2, 1, 3)

    q, k, v = heads(q), heads(k), heads(v)
    s = jnp.einsum("bhqd,bhkd->bhqk", q, k) / math.sqrt(D)
    mask = jnp.tril(jnp.ones((T, T), dtype=bool))
    s = jnp.where(mask, s, -jnp.inf)
    p = jax.nn.softmax(s, axis=-1)
    y = jnp.einsum("bhqk,bhkd->bhqd", p, v)
    y = y.transpose(0, 2, 1, 3).reshape(B, T, C)
    return y @ w_proj + b_proj.reshape(1, 1, -1)


if __name__ == "__main__":
    # --- tiny single-tile config -------------------------------------------
    B, T, n_embd, n_head = 2, 8, 32, 4

    key = jax.random.PRNGKey(0)
    kx, kwa, kba, kwp, kbp, kx2, kwa2, kba2, kwp2, kbp2 = jax.random.split(key, 10)
    x = jax.random.normal(kx, (B, T, n_embd), dtype=jnp.float32)
    w_attn = jax.random.normal(kwa, (n_embd, 3 * n_embd), jnp.float32) * 0.02
    b_attn = jax.random.normal(kba, (3 * n_embd,), jnp.float32) * 0.02
    w_proj = jax.random.normal(kwp, (n_embd, n_embd), jnp.float32) * 0.02
    b_proj = jax.random.normal(kbp, (n_embd,), jnp.float32) * 0.02

    ref = reference(x, w_attn, b_attn, w_proj, b_proj, n_head=n_head)

    # 1) exact f32 MXU path — tight check of the flash / tiling logic.
    out_f32 = causal_self_attention(x, w_attn, b_attn, w_proj, b_proj,
                                    n_head=n_head, mxu_dtype=jnp.float32)
    out_f32 = jax.block_until_ready(out_f32)
    assert out_f32.shape == (B, T, n_embd)
    assert jnp.allclose(out_f32, ref, atol=1e-4, rtol=1e-4), "f32 path mismatch"

    # 2) default bf16-MXU path (f32 accumulation / softmax statistics).
    out_bf16 = causal_self_attention(x, w_attn, b_attn, w_proj, b_proj,
                                     n_head=n_head)
    out_bf16 = jax.block_until_ready(out_bf16)
    assert jnp.allclose(out_bf16, ref, atol=3e-2, rtol=3e-2), "bf16 path mismatch"

    # 3) multi-tile config (several q/kv/row/column tiles, tk != tq, D=64):
    #    exercises the online-softmax carry, causal tile skipping, diagonal-only
    #    masking, N-tiled linears and the per-head (B, T, H, D) output assembly.
    B3, T3, C3, H3 = 2, 64, 128, 2
    x3 = jax.random.normal(kx2, (B3, T3, C3), jnp.float32)
    w_attn3 = jax.random.normal(kwa2, (C3, 3 * C3), jnp.float32) * 0.02
    b_attn3 = jax.random.normal(kba2, (3 * C3,), jnp.float32) * 0.02
    w_proj3 = jax.random.normal(kwp2, (C3, C3), jnp.float32) * 0.02
    b_proj3 = jax.random.normal(kbp2, (C3,), jnp.float32) * 0.02
    ref3 = reference(x3, w_attn3, b_attn3, w_proj3, b_proj3, n_head=H3)
    out3 = causal_self_attention(x3, w_attn3, b_attn3, w_proj3, b_proj3,
                                 n_head=H3, mxu_dtype=jnp.float32,
                                 tq=16, tk=32, tm=32, tn=128)
    out3 = jax.block_until_ready(out3)
    assert jnp.allclose(out3, ref3, atol=1e-4, rtol=1e-4), "tiled path mismatch"

    print("KERNEL_OK")
</pallas_src>

<mosaic_0001>
module attributes {stable_mosaic.version = 11 : i64} {
  func.func @_linear_kernel(%arg0: i32, %arg1: i32, %arg2: memref<16x32xf32, #tpu.memory_space<vmem>>, %arg3: memref<32x96xf32, #tpu.memory_space<vmem>>, %arg4: memref<1x96xf32, #tpu.memory_space<vmem>>, %arg5: memref<16x96xf32, #tpu.memory_space<vmem>>) attributes {dimension_semantics = [#tpu.dimension_semantics<parallel>, #tpu.dimension_semantics<parallel>], iteration_bounds = array<i64: 1, 1>, scalar_prefetch = 0 : i64, scratch_operands = 0 : i64, tpu.core_type = #tpu.core_type<tc>, window_params = [{transform_indices = @transform_0, window_bounds = array<i64: 16, 32>}, {transform_indices = @transform_1, window_bounds = array<i64: 32, 96>}, {transform_indices = @transform_2, window_bounds = array<i64: 1, 96>}, {transform_indices = @transform_3, window_bounds = array<i64: 16, 96>}]} {
    %c0 = arith.constant 0 : index
    %c0_0 = arith.constant 0 : index
    %0 = vector.load %arg2[%c0, %c0_0] : memref<16x32xf32, #tpu.memory_space<vmem>>, vector<16x32xf32>
    %c0_1 = arith.constant 0 : index
    %c0_2 = arith.constant 0 : index
    %1 = vector.load %arg3[%c0_1, %c0_2] : memref<32x96xf32, #tpu.memory_space<vmem>>, vector<32x96xf32>
    %cst = arith.constant dense<0.000000e+00> : vector<16x96xf32>
    %2 = tpu.matmul %0, %1, %cst {dimension_numbers = #tpu.dot_dimension_numbers<[1], [0], [0], [1], [0, 0, 1, 1], [], []>} : vector<16x32xf32>, vector<32x96xf32>, vector<16x96xf32> -> vector<16x96xf32>
    %c0_3 = arith.constant 0 : index
    %c0_4 = arith.constant 0 : index
    %3 = vector.load %arg4[%c0_3, %c0_4] : memref<1x96xf32, #tpu.memory_space<vmem>>, vector<1x96xf32>
    %4 = vector.broadcast %3 : vector<1x96xf32> to vector<16x96xf32>
    %5 = arith.addf %2, %4 : vector<16x96xf32>
    %c0_5 = arith.constant 0 : index
    %c0_6 = arith.constant 0 : index
    %6 = vector.load %arg5[%c0_5, %c0_6] : memref<16x96xf32, #tpu.memory_space<vmem>>, vector<16x96xf32>
    tpu.vector_store %arg5[%c0_5, %c0_6], %5 {strides = array<i32>} : memref<16x96xf32, #tpu.memory_space<vmem>>, vector<16x96xf32>,
    return
  }
  func.func @transform_0(%arg0: i32, %arg1: i32) -> (i32, i32) {
    %c0_i32 = arith.constant 0 : i32
    %c0_i32_0 = arith.constant 0 : i32
    return %arg1, %c0_i32 : i32, i32
  }
  func.func @transform_1(%arg0: i32, %arg1: i32) -> (i32, i32) {
    %c0_i32 = arith.constant 0 : i32
    %c0_i32_0 = arith.constant 0 : i32
    return %c0_i32, %arg0 : i32, i32
  }
  func.func @transform_2(%arg0: i32, %arg1: i32) -> (i32, i32) {
    %c0_i32 = arith.constant 0 : i32
    %c0_i32_0 = arith.constant 0 : i32
    return %c0_i32, %arg0 : i32, i32
  }
  func.func @transform_3(%arg0: i32, %arg1: i32) -> (i32, i32) {
    %c0_i32 = arith.constant 0 : i32
    return %arg1, %arg0 : i32, i32
  }
}

</mosaic_0001>

<bundles_post_ra>
// kernel: tpu_custom_call.1
= control target key start
LH: loop header
LB: loop body
LE: loop exit
PB: predicated region body
PF: predicated region fallthrough
CT: control target
= control target key end

     0   :  { %8 = vsyncpa [#allocation3], 0  ;;  %s246_s0 = inlined_call_operand.hbm [shape: f32[16,32], index: 0, kind: input, shape index: {}]   ;;  %s247_s1 = inlined_call_operand.hbm [shape: f32[32,96], index: 1, kind: input, shape index: {}]   ;;  %s248_s2 = inlined_call_operand.vmem [shape: f32[1,96], index: 2, kind: input, shape index: {}]   ;;  %s249_s3 = inlined_call_operand.hbm [shape: f32[16,96], index: 3, kind: output, shape index: {}]  }
   0x1   :  { %9 = vsyncpa [#allocation6], 0 }
   0x2   :  { %10 = vsyncpa [#allocation4], 0  ;;  %s15_s14 = sshll.u32 %s246_s0, 4  ;;  %s200_s15 = smov [#allocation2]   ;;  %s16_s14 = int_to_ptr.hbm [resolvable:$true] %s15_s14 }
   0x3   :  { %s17_s16 = sshll.u32 %s200_s15, 4  ;;  %s28_s19 = sshll.u32 %s247_s1, 4  ;;  %s18_s16 = int_to_ptr.vmem [resolvable:$true] %s17_s16  ;;  %s29_s19 = int_to_ptr.hbm [resolvable:$true] %s28_s19 }
   0x4   :  { %s201_s20 = smov 128   ;;  %s202_s21 = smov 8  }
   0x5   :  { %23 = dma.hbm_to_vmem [thread:$0]  %s16_s14, 256, %s18_s16, [#allocation3], %s201_s20, %s201_s20, %s202_s21  }
   0x6   :  { %s203_s22 = smov [#allocation5]  }
   0x7   :  { %s30_s23 = sshll.u32 %s203_s22, 4  ;;  %s31_s23 = int_to_ptr.vmem [resolvable:$true] %s30_s23 }
   0x8   :  { %36 = dma.hbm_to_vmem [thread:$0]  %s29_s19, 512, %s31_s23, [#allocation6], %s201_s20, %s201_s20, %s202_s21  }
   0x9   :  { %194 = dma.done.wait [#allocation3], 256  }
   0xa   :  { %195 = vsyncadd [#allocation3], 4294967040 }
   0xb   :  { %196 = dma.done.wait [#allocation6], 512  }
   0xc   :  { %197 = vsyncadd [#allocation6], 4294966784  ;;  %v52_v0 = vld [vmem:[#allocation5 + $0x18] sm:$0xff]  ;;  %v51_v1 = vld [vmem:[#allocation5 + $0x10] sm:$0xff]  ;;  %vm57_vm0 = vcmask 261120   ;;  %s204_s24 = smov [#allocation7]  }
   0xd   :  { %76 = vmatpush.msra.mxu0 %v52_v0  ;;  %112 = vmatpush.msra.mxu1 %v52_v0  ;;  %v50_v2 = vld [vmem:[#allocation5 + $0x8] sm:$0xff]  ;;  %v49_v3 = vld [vmem:[#allocation5] sm:$0xff]  ;;  %v47_v4 = vld [vmem:[#allocation2] sm:$0xff]  ;;  %s94_s25 = sshll.u32 %s204_s24, 4  ;;  %s96_s28 = sshll.u32 %s249_s3, 4  ;;  %vm87_vm1 = vcmask 785408   ;;  %s95_s25 = int_to_ptr.vmem [resolvable:$true] %s94_s25  ;;  %s97_s28 = int_to_ptr.hbm [resolvable:$true] %s96_s28 }
   0xe   :  { %v48_v5 = vld [vmem:[#allocation2 + $0x8] sm:$0xff]  ;;  %v121_v6 = vld [vmem:[%s248_s2] ss:$0 sm:$0xff] }
   0xf   :  { %77 = vmatpush.msra.mxu0 %v51_v1  ;;  %113 = vmatpush.msra.mxu1 %v51_v1 }
  0x11   :  { %78 = vmatpush.msra.mxu0 %v50_v2  ;;  %114 = vmatpush.msra.mxu1 %v50_v2 }
  0x13   :  { %79 = vmatpush.msra.mxu0 %v49_v3  ;;  %115 = vmatpush.msra.mxu1 %v49_v3 }
  0x14   :  { %110 = vmatmul.msk.f32.vlgmr.msra.gmra.mxu0 %vm57_vm0, %v47_v4  ;;  %111 = vmatmul.msk.f32.vlgmr.msra.gmra.mxu1 %vm57_vm0, %v48_v5 }
  0x91   :  { %v81_v7 = vpop.f32.mrf.mxu0  ;;  %v84_v8 = vpop.f32.mrf.mxu1 }
  0x92   :  { %v82_v9 = vadd.f32 %v121_v6, %v81_v7  ;;  %v85_v10 = vadd.f32 %v121_v6, %v84_v8 }
  0x94   :  { %88 = vst.msk [vmem:[#allocation7] sm:$0xff] %vm87_vm1, %v82_v9 }
  0x95   :  { %89 = vst.msk [vmem:[#allocation7 + $0x8] sm:$0xff] %vm87_vm1, %v85_v10 }
  0x96   :  { %102 = dma.vmem_to_hbm [thread:$0]  %s95_s25, 256, %s97_s28, [#allocation4], %s201_s20, %s201_s20, %s202_s21  }
  0x97   :  { %198 = dma.done.wait [#allocation4], 256  }
  0x98   :  { %199 = vsyncadd [#allocation4], 4294967040 }
  0x99   :  { %107 = vsyncpa [#allocation3], 1 }
  0x9a   :  { %108 = vsyncpa [#allocation6], 1 }
  0x9b   :  { %109 = vsyncpa [#allocation4], 1 }

</bundles_post_ra>
